<compile_context>
chip_gen: v5e
topology: v5e:2x2
jax: 0.10.0
libtpu: 0.0.40
codegen_flags: <defaults>
</compile_context>

<pallas_src>
import functools

import jax
import jax.numpy as jnp
from jax.experimental import pallas as pl
from jax.experimental.pallas import tpu as pltpu


def _round_up(v, m):
    return ((v + m - 1) // m) * m


def _vmem_capacity_bytes():
    # Generation-aware VMEM capacity (v5e/v6e: 128 MiB, v7x: 64 MiB per TensorCore).
    try:
        return int(pltpu.get_tpu_info().vmem_capacity_bytes)
    except Exception:
        return 64 * 1024 * 1024      # conservative default (v7x per-core VMEM)


# ---------------------------------------------------------------------------
# Fused single-read kernel (grid = (B,)).  The whole (C, HW_pad) slab of one
# batch element is resident in VMEM; x is read from HBM exactly once.
# The tiny cross-channel conv is evaluated through a (C, C) band matrix built
# in VMEM from 2-D iotas + the k tap weights (no shifts/concats/transposes ->
# robust lowering); its footprint is included in the fused-path VMEM check.
# ---------------------------------------------------------------------------
def _fused_kernel(w_ref, x_ref, o_ref, *, inv_hw, k_size, c, use_mxu):
    pad = (k_size - 1) // 2
    xb = x_ref[0]                                          # (C, HW_pad)
    w = w_ref[...].astype(jnp.float32)                     # (k, C) if use_mxu else (C, k)
    row = jax.lax.broadcasted_iota(jnp.int32, (c, c), 0)
    col = jax.lax.broadcasted_iota(jnp.int32, (c, c), 1)

    if use_mxu:
        # Channel means on the MXU (f32 accumulate, no VALU upcast of bf16 x).
        ones_col = jnp.ones((xb.shape[-1], 1), dtype=xb.dtype)
        m = jax.lax.dot_general(xb, ones_col, (((1,), (0,)), ((), ())),
                                preferred_element_type=jnp.float32) * inv_hw   # (C, 1)
        # bandT[r, i] = w[i, r - i + pad]  (zero outside the k-tap window / channel range)
        bandT = jnp.zeros((c, c), jnp.float32)
        for j in range(k_size):                            # k is small and static
            bandT = bandT + jnp.where(row - col == (j - pad), w[j:j + 1, :], 0.0)
        s_row = jnp.sum(bandT * m, axis=0, keepdims=True)  # (1, C)
        a_row = jax.nn.sigmoid(s_row)                      # (1, C)  -- EUP
        # Weighted channel sum on the MXU: (1, C) @ (C, HW_pad), f32 accumulate.
        o = jax.lax.dot_general(a_row.astype(xb.dtype), xb, (((1,), (0,)), ((), ())),
                                preferred_element_type=jnp.float32)
    else:
        xf = xb.astype(jnp.float32)                        # no-op for f32 inputs
        m = jnp.sum(xf, axis=-1, keepdims=True) * inv_hw   # (C, 1)
        # band[i, c2] = w[i, c2 - i + pad]  (zero outside the k-tap window / channel range)
        band = jnp.zeros((c, c), jnp.float32)
        for j in range(k_size):
            band = band + jnp.where(col - row == (j - pad), w[:, j:j + 1], 0.0)
        s_col = jax.lax.dot_general(band, m, (((1,), (0,)), ((), ())),
                                    preferred_element_type=jnp.float32)        # (C, 1)
        a_col = jax.nn.sigmoid(s_col)                      # (C, 1)
        o = jnp.sum(a_col * xf, axis=0, keepdims=True)     # (1, HW_pad)

    o_ref[0] = o.astype(o_ref.dtype)


# ---------------------------------------------------------------------------
# Two-pass streaming fallback, kernel A: per-channel spatial means.
# Grid (B, n_c, n_hw): channel axis is parallel (v7x dual TensorCore), the HW
# reduction axis is last / "arbitrary"; accumulation in the resident f32 block.
# ---------------------------------------------------------------------------
def _mean_kernel(x_ref, m_ref, *, inv_hw, use_mxu):
    h = pl.program_id(2)

    @pl.when(h == 0)
    def _init():
        m_ref[...] = jnp.zeros_like(m_ref)

    xb = x_ref[0]                                          # (tc, thw)
    if use_mxu:
        ones_col = jnp.ones((xb.shape[-1], 1), dtype=xb.dtype)
        part = jax.lax.dot_general(xb, ones_col, (((1,), (0,)), ((), ())),
                                   preferred_element_type=jnp.float32)
    else:
        part = jnp.sum(xb.astype(jnp.float32), axis=-1, keepdims=True)
    m_ref[...] += part[None]

    @pl.when(h == pl.num_programs(2) - 1)
    def _finalize():
        m_ref[...] = m_ref[...] * inv_hw


# ---------------------------------------------------------------------------
# Two-pass streaming fallback, kernel B: sigmoid + weighted channel reduction.
# ---------------------------------------------------------------------------
def _wsum_kernel(s_ref, x_ref, o_ref, *, use_mxu):
    xb = x_ref[0]                                          # (C, thw)
    if use_mxu:
        a_row = jax.nn.sigmoid(s_ref[0].astype(jnp.float32))       # (1, C)
        o = jax.lax.dot_general(a_row.astype(xb.dtype), xb, (((1,), (0,)), ((), ())),
                                preferred_element_type=jnp.float32)
    else:
        a_col = jax.nn.sigmoid(s_ref[0].astype(jnp.float32))       # (C, 1)
        o = jnp.sum(a_col * xb.astype(jnp.float32), axis=0, keepdims=True)
    o_ref[0] = o.astype(o_ref.dtype)


def eca_layer_one_forward(x, conv_weight, k_size, *, force_two_pass=False):
    """x: (B, C, H, W); conv_weight: (C, 1, k) (PyTorch Conv1d(C, C, k, groups=C) weight)."""
    assert k_size % 2 == 1, "eca_layer_one only shape-checks for odd k_size"
    B, C, H, W = x.shape
    HW = H * W
    itemsize = x.dtype.itemsize
    inv_hw = 1.0 / HW

    # bf16 goes through the MXU (native bf16, f32 accumulation); f32 stays on the exact
    # VPU path (ample VALU slack at 4-byte HBM traffic, no MXU rounding).
    use_mxu = (x.dtype == jnp.bfloat16)

    vmem_cap = _vmem_capacity_bytes()
    w_ck = jnp.asarray(conv_weight, jnp.float32).reshape(C, k_size)   # (C, k)

    # ------------------------- fused single-read path -------------------------
    hw_pad_f = _round_up(HW, 128)            # lane-dense (unmasked vld/vst), zero padded
    slab = C * hw_pad_f * itemsize
    band_tmp = 3 * 4 * C * C                 # in-kernel (C, C) band matrix + live temps
    vpu_tmp = 0 if use_mxu else 2 * C * hw_pad_f * 4
    need_fused = (2 * slab                   # double-buffered x block
                  + 2 * hw_pad_f * itemsize  # double-buffered output block
                  + band_tmp + vpu_tmp + C * k_size * 4 + (1 << 20))
    fused_ok = (not force_two_pass
                and need_fused <= int(0.4 * vmem_cap)
                and C <= 8 * hw_pad_f)       # don't let the C^2 band dominate tiny slabs

    if fused_ok:
        x3 = x.reshape(B, C, HW)
        if hw_pad_f > HW:
            x3 = jnp.pad(x3, ((0, 0), (0, 0), (0, hw_pad_f - HW)))
        w_in = w_ck.T if use_mxu else w_ck                 # (k, C) for MXU, (C, k) for VPU
        vmem_limit = min(int(0.9 * vmem_cap), max(32 << 20, need_fused + (4 << 20)))
        out3 = pl.pallas_call(
            functools.partial(_fused_kernel, inv_hw=inv_hw, k_size=k_size,
                              c=C, use_mxu=use_mxu),
            out_shape=jax.ShapeDtypeStruct((B, 1, hw_pad_f), x.dtype),
            grid=(B,),
            in_specs=[
                pl.BlockSpec(tuple(w_in.shape), lambda b: (0, 0)),
                pl.BlockSpec((1, C, hw_pad_f), lambda b: (b, 0, 0)),
            ],
            out_specs=pl.BlockSpec((1, 1, hw_pad_f), lambda b: (b, 0, 0)),
            compiler_params=pltpu.CompilerParams(
                dimension_semantics=("parallel",),
                vmem_limit_bytes=vmem_limit),
            cost_estimate=pl.CostEstimate(
                flops=int(4 * B * C * hw_pad_f + 2 * B * k_size * C * C),
                transcendentals=int(B * C),
                bytes_accessed=int(B * C * hw_pad_f * itemsize
                                   + B * hw_pad_f * itemsize + C * k_size * 4)),
        )(w_in, x3)
        return out3[:, :, :HW].reshape(B, 1, H, W)

    # ------------------------ two-pass streaming fallback ------------------------
    # Per-pipeline-buffer budget for the streamed x block (generation aware).
    budget = max(512 << 10, min(12 << 20, vmem_cap // 10))
    target = max(128, (budget // max(1, C * itemsize)) // 128 * 128)
    thw = min(target, _round_up(HW, 128))
    hw_pad = _round_up(HW, thw)
    n_hw = hw_pad // thw

    x3 = x.reshape(B, C, HW)
    if hw_pad > HW:
        x3 = jnp.pad(x3, ((0, 0), (0, 0), (0, hw_pad - HW)))

    # Channel tiling on the reduction kernel keeps both v7x TensorCores busy at B == 1;
    # harmless on single-TC v5e / v6e.
    tc = C // 2 if (C % 16 == 0) else C
    n_c = C // tc

    need_a = 2 * tc * thw * itemsize + 2 * tc * 4 + (1 << 20)
    means = pl.pallas_call(
        functools.partial(_mean_kernel, inv_hw=inv_hw, use_mxu=use_mxu),
        out_shape=jax.ShapeDtypeStruct((B, C, 1), jnp.float32),
        grid=(B, n_c, n_hw),
        in_specs=[pl.BlockSpec((1, tc, thw), lambda b, ci, h: (b, ci, h))],
        out_specs=pl.BlockSpec((1, tc, 1), lambda b, ci, h: (b, ci, 0)),
        compiler_params=pltpu.CompilerParams(
            dimension_semantics=("parallel", "parallel", "arbitrary"),
            vmem_limit_bytes=min(int(0.9 * vmem_cap), max(32 << 20, need_a + (2 << 20)))),
        cost_estimate=pl.CostEstimate(
            flops=int(2 * B * C * hw_pad),
            transcendentals=0,
            bytes_accessed=int(B * C * hw_pad * itemsize + B * C * 4)),
    )(x3)

    # Tiny O(B*C*k) cross-channel conv on the pooled vector (shifted adds, no dense
    # (C, C) band matrix, no big intermediate HBM round trips).
    pad = (k_size - 1) // 2
    m2 = means[:, :, 0]                                     # (B, C) f32
    m_padded = jnp.pad(m2, ((0, 0), (pad, pad)))
    scores = jnp.zeros((B, C), jnp.float32)
    for j in range(k_size):
        scores = scores + w_ck[None, :, j] * m_padded[:, j:j + C]
    # Row layout (B, 1, C) for the MXU variant, column layout (B, C, 1) for the VPU one.
    scores_in = scores[:, None, :] if use_mxu else scores[:, :, None]
    s_block = (1, 1, C) if use_mxu else (1, C, 1)

    vpu_tmp_b = 0 if use_mxu else 2 * C * thw * 4
    need_b = 2 * C * thw * itemsize + 2 * thw * itemsize + 2 * C * 4 + vpu_tmp_b + (1 << 20)
    out3 = pl.pallas_call(
        functools.partial(_wsum_kernel, use_mxu=use_mxu),
        out_shape=jax.ShapeDtypeStruct((B, 1, hw_pad), x.dtype),
        grid=(B, n_hw),
        in_specs=[
            pl.BlockSpec(s_block, lambda b, h: (b, 0, 0)),
            pl.BlockSpec((1, C, thw), lambda b, h: (b, 0, h)),
        ],
        out_specs=pl.BlockSpec((1, 1, thw), lambda b, h: (b, 0, h)),
        compiler_params=pltpu.CompilerParams(
            dimension_semantics=("parallel", "parallel"),
            vmem_limit_bytes=min(int(0.9 * vmem_cap), max(32 << 20, need_b + (2 << 20)))),
        cost_estimate=pl.CostEstimate(
            flops=int(2 * B * C * hw_pad),
            transcendentals=int(B * C),
            bytes_accessed=int(B * C * hw_pad * itemsize + B * C * 4
                               + B * hw_pad * itemsize)),
    )(scores_in, x3)

    return out3[:, :, :HW].reshape(B, 1, H, W)


def _reference(x, conv_weight, k_size):
    """Pure-JAX reference (avg_pool + unfold + grouped conv + sigmoid + weighted sum)."""
    B, C, H, W = x.shape
    xf = x.astype(jnp.float32)
    m = jnp.mean(xf, axis=(2, 3))                           # (B, C)
    pad = (k_size - 1) // 2
    m_pad = jnp.pad(m, ((0, 0), (pad, pad)))
    w2 = jnp.asarray(conv_weight, jnp.float32).reshape(C, k_size)
    s = jnp.zeros((B, C), jnp.float32)
    for j in range(k_size):
        s = s + w2[None, :, j] * m_pad[:, j:j + C]
    a = jax.nn.sigmoid(s)
    return jnp.sum(xf * a[:, :, None, None], axis=1, keepdims=True)


if __name__ == "__main__":
    key = jax.random.PRNGKey(0)
    configs = [
        # (B, C, H, W, K, dtype,        force_two_pass, atol)
        (2, 8, 16, 16, 3, jnp.float32,  False, 1e-3),   # fused single-read path (f32 / VPU)
        (2, 8, 16, 16, 3, jnp.float32,  True,  1e-4),   # two-pass streaming fallback
        (2, 8, 12, 12, 3, jnp.bfloat16, False, 1e-1),   # fused, MXU path, padded HW (144->256)
        (2, 8, 16, 16, 5, jnp.bfloat16, True,  1e-1),   # two-pass, MXU path, k=5
    ]
    for (B, C, H, W, K, dt, two_pass, atol) in configs:
        key, kx, kw = jax.random.split(key, 3)
        x = jax.random.normal(kx, (B, C, H, W), jnp.float32).astype(dt)
        # Conv1d(C, C, K, bias=False, groups=C) weight: (C, 1, K), PyTorch-style uniform init.
        bound = 1.0 / (K ** 0.5)
        conv_w = jax.random.uniform(kw, (C, 1, K), jnp.float32, minval=-bound, maxval=bound)

        out = jax.block_until_ready(
            eca_layer_one_forward(x, conv_w, K, force_two_pass=two_pass))
        ref = _reference(x, conv_w, K)

        assert out.shape == (B, 1, H, W), (out.shape, (B, 1, H, W))
        err = float(jnp.max(jnp.abs(out.astype(jnp.float32) - ref)))
        assert err <= atol, (B, C, H, W, K, str(dt), two_pass, err)
    print("KERNEL_OK")
</pallas_src>

<mosaic_0001>
module attributes {stable_mosaic.version = 11 : i64} {
  func.func @_fused_kernel(%arg0: i32, %arg1: memref<8x3xf32, #tpu.memory_space<vmem>>, %arg2: memref<1x8x256xf32, #tpu.memory_space<vmem>>, %arg3: memref<1x1x256xf32, #tpu.memory_space<vmem>>) attributes {dimension_semantics = [#tpu.dimension_semantics<parallel>], iteration_bounds = array<i64: 2>, scalar_prefetch = 0 : i64, scratch_operands = 0 : i64, tpu.core_type = #tpu.core_type<tc>, window_params = [{pipeline_mode = #tpu.pipeline_mode<synchronous>, transform_indices = @transform_0, window_bounds = array<i64: 8, 3>}, {transform_indices = @transform_1, window_bounds = array<i64: 1, 8, 256>}, {transform_indices = @transform_2, window_bounds = array<i64: 1, 1, 256>}]} {
    %c0 = arith.constant 0 : index
    %c0_0 = arith.constant 0 : index
    %c0_1 = arith.constant 0 : index
    %0 = vector.load %arg2[%c0, %c0_0, %c0_1] : memref<1x8x256xf32, #tpu.memory_space<vmem>>, vector<1x8x256xf32>
    %1 = vector.shape_cast %0 : vector<1x8x256xf32> to vector<8x256xf32>
    %c0_2 = arith.constant 0 : index
    %c0_3 = arith.constant 0 : index
    %2 = vector.load %arg1[%c0_2, %c0_3] : memref<8x3xf32, #tpu.memory_space<vmem>>, vector<8x3xf32>
    %3 = tpu.iota {dimensions = array<i32: 0>} : vector<8x8xi32>
    %4 = tpu.iota {dimensions = array<i32: 1>} : vector<8x8xi32>
    %cst = arith.constant dense<0.000000e+00> : vector<8xf32>
    %5 = vector.multi_reduction <add>, %1, %cst [1] : vector<8x256xf32> to vector<8xf32>
    %6 = vector.shape_cast %5 : vector<8xf32> to vector<8x1xf32>
    %cst_4 = arith.constant 3.906250e-03 : f32
    %7 = vector.broadcast %cst_4 : f32 to vector<8x1xf32>
    %8 = arith.mulf %6, %7 : vector<8x1xf32>
    %cst_5 = arith.constant 0.000000e+00 : f32
    %9 = vector.broadcast %cst_5 : f32 to vector<8x8xf32>
    %10 = arith.subi %4, %3 : vector<8x8xi32>
    %c-1_i32 = arith.constant -1 : i32
    %11 = vector.broadcast %c-1_i32 : i32 to vector<8x8xi32>
    %12 = arith.cmpi eq, %10, %11 : vector<8x8xi32>
    %13 = vector.extract_strided_slice %2 {offsets = [0, 0], sizes = [8, 1], strides = [1, 1]} : vector<8x3xf32> to vector<8x1xf32>
    %cst_6 = arith.constant 0.000000e+00 : f32
    %14 = vector.shape_cast %13 : vector<8x1xf32> to vector<8x1xf32>
    %15 = vector.broadcast %14 : vector<8x1xf32> to vector<8x8xf32>
    %16 = vector.broadcast %cst_6 : f32 to vector<8x8xf32>
    %17 = arith.select %12, %15, %16 : vector<8x8xi1>, vector<8x8xf32>
    %18 = arith.addf %9, %17 : vector<8x8xf32>
    %19 = arith.subi %4, %3 : vector<8x8xi32>
    %c0_i32 = arith.constant 0 : i32
    %20 = vector.broadcast %c0_i32 : i32 to vector<8x8xi32>
    %21 = arith.cmpi eq, %19, %20 : vector<8x8xi32>
    %22 = vector.extract_strided_slice %2 {offsets = [0, 1], sizes = [8, 1], strides = [1, 1]} : vector<8x3xf32> to vector<8x1xf32>
    %cst_7 = arith.constant 0.000000e+00 : f32
    %23 = vector.shape_cast %22 : vector<8x1xf32> to vector<8x1xf32>
    %24 = vector.broadcast %23 : vector<8x1xf32> to vector<8x8xf32>
    %25 = vector.broadcast %cst_7 : f32 to vector<8x8xf32>
    %26 = arith.select %21, %24, %25 : vector<8x8xi1>, vector<8x8xf32>
    %27 = arith.addf %18, %26 : vector<8x8xf32>
    %28 = arith.subi %4, %3 : vector<8x8xi32>
    %c1_i32 = arith.constant 1 : i32
    %29 = vector.broadcast %c1_i32 : i32 to vector<8x8xi32>
    %30 = arith.cmpi eq, %28, %29 : vector<8x8xi32>
    %31 = vector.extract_strided_slice %2 {offsets = [0, 2], sizes = [8, 1], strides = [1, 1]} : vector<8x3xf32> to vector<8x1xf32>
    %cst_8 = arith.constant 0.000000e+00 : f32
    %32 = vector.shape_cast %31 : vector<8x1xf32> to vector<8x1xf32>
    %33 = vector.broadcast %32 : vector<8x1xf32> to vector<8x8xf32>
    %34 = vector.broadcast %cst_8 : f32 to vector<8x8xf32>
    %35 = arith.select %30, %33, %34 : vector<8x8xi1>, vector<8x8xf32>
    %36 = arith.addf %27, %35 : vector<8x8xf32>
    %cst_9 = arith.constant dense<0.000000e+00> : vector<8x1xf32>
    %37 = tpu.matmul %36, %8, %cst_9 {dimension_numbers = #tpu.dot_dimension_numbers<[1], [0], [0], [1], [0, 0, 1, 1], [], []>} : vector<8x8xf32>, vector<8x1xf32>, vector<8x1xf32> -> vector<8x1xf32>
    %38 = arith.negf %37 : vector<8x1xf32>
    %39 = math.exp %38 : vector<8x1xf32>
    %cst_10 = arith.constant 1.000000e+00 : f32
    %40 = vector.broadcast %cst_10 : f32 to vector<8x1xf32>
    %41 = arith.addf %40, %39 : vector<8x1xf32>
    %42 = arith.divf %40, %41 : vector<8x1xf32>
    %43 = vector.broadcast %42 : vector<8x1xf32> to vector<8x256xf32>
    %44 = arith.mulf %43, %1 : vector<8x256xf32>
    %cst_11 = arith.constant dense<0.000000e+00> : vector<256xf32>
    %45 = vector.multi_reduction <add>, %44, %cst_11 [0] : vector<8x256xf32> to vector<256xf32>
    %46 = vector.shape_cast %45 : vector<256xf32> to vector<1x256xf32>
    %c0_12 = arith.constant 0 : index
    %c0_13 = arith.constant 0 : index
    %c0_14 = arith.constant 0 : index
    %47 = vector.load %arg3[%c0_12, %c0_13, %c0_14] : memref<1x1x256xf32, #tpu.memory_space<vmem>>, vector<1x1x256xf32>
    %48 = vector.shape_cast %47 : vector<1x1x256xf32> to vector<1x256xf32>
    %49 = vector.shape_cast %46 : vector<1x256xf32> to vector<1x1x256xf32>
    tpu.vector_store %arg3[%c0_12, %c0_13, %c0_14], %49 {strides = array<i32>} : memref<1x1x256xf32, #tpu.memory_space<vmem>>, vector<1x1x256xf32>,
    return
  }
  func.func @transform_0(%arg0: i32) -> (i32, i32) {
    %c0_i32 = arith.constant 0 : i32
    %c0_i32_0 = arith.constant 0 : i32
    %c0_i32_1 = arith.constant 0 : i32
    return %c0_i32, %c0_i32_0 : i32, i32
  }
  func.func @transform_1(%arg0: i32) -> (i32, i32, i32) {
    %c0_i32 = arith.constant 0 : i32
    %c0_i32_0 = arith.constant 0 : i32
    %c0_i32_1 = arith.constant 0 : i32
    return %arg0, %c0_i32, %c0_i32_0 : i32, i32, i32
  }
  func.func @transform_2(%arg0: i32) -> (i32, i32, i32) {
    %c0_i32 = arith.constant 0 : i32
    %c0_i32_0 = arith.constant 0 : i32
    %c0_i32_1 = arith.constant 0 : i32
    return %arg0, %c0_i32, %c0_i32_0 : i32, i32, i32
  }
}

</mosaic_0001>

<bundles_post_ra>
// kernel: tpu_custom_call.1
= control target key start
LH: loop header
LB: loop body
LE: loop exit
PB: predicated region body
PF: predicated region fallthrough
CT: control target
= control target key end

     0   :  { %7 = vsyncpa [#allocation3], 0  ;;  %s676_s0 = inlined_call_operand.vmem [shape: f32[8,3], index: 0, kind: input, shape index: {}]   ;;  %s677_s1 = inlined_call_operand.hbm [shape: f32[2,8,256], index: 1, kind: input, shape index: {}]   ;;  %s678_s2 = inlined_call_operand.hbm [shape: f32[2,1,256], index: 2, kind: output, shape index: {}]  }
   0x1   :  { %9 = vsyncpa [#allocation3 + $0x1], 0 }
   0x2   :  { %10 = vsyncpa [#allocation4], 0 }
   0x3   :  { %12 = vsyncpa [#allocation4 + $0x1], 0  ;;  %s545_s9 = smov 0   ;;  %s547_s10 = smov 0  }
   0x4   :  { %s549_s11 = smov 0   ;;  %s551_s12 = smov 0  }
   0x5 LB: > { %s566_s13 = sadd.s32 4294967295, %s525_s12   ;;  %s355_s14 = sadd.s32 4294967294, %s525_s12   ;;  %s525_s12 = sphi %s551_s12, %s688_s12   ;;  %s521_s11 = sphi %s549_s11, %s687_s11   ;;  %s517_s10 = sphi %s547_s10, %s686_s10   ;;  %s513_s9 = sphi %s545_s9, %s685_s9  }
   0x6   : > { %s570_s15 = sadd.s32 1, %s525_s12   ;;  %s46_s16 = sadd.s32 1, %s521_s11 }
   0x7   : > { %s43_s17 = ssub.s32 %s525_s12, %s570_s15  ;;  %p53_p0 = scmp.ne.s32.totalorder %s521_s11, %s517_s10 }
   0x8   : > { %p44_p1 = scmp.eq.s32.totalorder %s43_s17, 0  ;;  %p54_p2 = scmp.eq.s32.totalorder %s525_s12, 0 }
   0x9   : > { %p59_p3 = scmp.ne.s32.totalorder %s517_s10, %s513_s9  ;;  %p60_p4 = scmp.eq.s32.totalorder %s566_s13, 0 }
   0xa   : > { %s582_s18 = scalar_select %p44_p1, %s521_s11, %s46_s16  }
   0xb   : > { %p584_p5 = por %p54_p2, %p53_p0  ;;  %p588_p6 = por %p60_p4, %p59_p3 }
   0xc   : > { %p83_p7 = scmp.eq.s32.totalorder %s566_s13, 1  ;;  %p89_p8 = scmp.eq.s32.totalorder %s355_s14, 1 }
   0xd   : > { %p383_p10 = scmp.lt.s32.totalorder %s525_s12, 2  ;;  %s112_s23 = sand.u32 1, %s521_s11  }
   0xe   : > { %p595_p11 = por %p83_p7, %p53_p0  ;;  %p599_p12 = por %p89_p8, %p59_p3 }
   0xf   : > { %s370_s24 = sshll.u32 %s525_s12, 4  ;;  %s358_s25 = sshll.u32 %s112_s23, 4 }
  0x10   : > { %s121_s28 = scalar_lea.hbm %s677_s1, %s370_s24  ;;  %s116_s30 = scalar_lea.vmem [#allocation2], %s358_s25 }
  0x11   : > { %s123_s29 = sshll.u32 %s121_s28, 4  ;;  %s125_s3 = sshll.u32 %s116_s30, 4  ;;  %s124_s29 = int_to_ptr.hbm [resolvable:$true] %s123_s29  ;;  %s126_s3 = int_to_ptr.vmem [resolvable:$true] %s125_s3 }
  0x12   : > { %p610_p13 = pnand %p383_p10, %p584_p5  ;;  %p361_p0 = scmp.ge.s32.totalorder %s525_s12, 1 }
  0x13   : > { %p130_p1 = scmp.lt.s32.totalorder %s525_s12, 3  ;;  %s113_s5 = scalar_lea.sflag [#allocation3], %s112_s23 }
  0x14   : > { %s429_s6 = sshra.s32 %s124_s29, 4  ;;  %p433_p3 = pneg %p610_p13  ;;  %s430_s6 = int_to_ptr.hbm [resolvable:$true] %s429_s6 }
  0x15   : > { %s431_s7 = scalar_lea.hbm %s430_s6, 16  ;;  %s436_s16 = scalar_lea.hbm %s677_s1, 32 }
  0x16   : > { %p432_p2 = scmp.ne.s32.totalorder %s430_s6, %s431_s7  ;;  %p437_p5 = scmp.lt.s32.totalorder %s430_s6, %s677_s1 }
  0x17   : > { %p438_p8 = scmp.lt.s32.totalorder %s436_s16, %s431_s7 }
  0x18   : > { %p434_p4 = pnand %p433_p3, %p432_p2 }
  0x19   : > { %p439_p10 = por %p438_p8, %p437_p5 }
  0x1a   : > { %p435_p7 = pneg %p434_p4 }
  0x1c   : > { %p440_p9 = pnand %p439_p10, %p435_p7 }
  0x1e   : > { %443 = shalt.err (!%p440_p9)
}
  0x1f   : > { %378 = dma.hbm_to_vmem [thread:$0]  (!%p610_p13), %s124_s29, 256, %s126_s3, %s113_s5  }
  0x20   : > { %p131_p2 = pnand %p361_p0, %p130_p1 }
  0x21   : > { %s631_s23 = sand.u32 (!%p131_p2), 1, %s517_s10  }
  0x22   : > { %134 = sbr.rel (%p131_p2) target bundleno = 451 (0x1c3), region = 28  ;;  %s362_s24 = sshll.u32 (!%p131_p2), %s631_s23, 4 }
  0x23   : > { %s137_s25 = scalar_lea.sflag (!%p131_p2), [#allocation3], %s631_s23  ;;  %s140_s26 = scalar_lea.vmem (!%p131_p2), [#allocation2], %s362_s24 }
  0x27   : > { %504 = dma.done.wait (%p588_p6), %s137_s25, 256  }
  0x28   : > { %506 = vsyncadd (%p588_p6), %s137_s25, 4294967040  ;;  %v527_v0 = vmov 0   ;;  %v528_v1 = vmov 2   ;;  %v162_v2 = vld [vmem:[%s140_s26] sm:$0xff]  ;;  %v163_v3 = vld [vmem:[%s140_s26 + $0x8] sm:$0xff]  ;;  %v529_v6 = vmov 1   ;;  %v165_v9 = vlaneseq }
  0x29   : > { %420 = vset.pattern.permute.xlu0 %v527_v0  ;;  %422 = vset.pattern.permute.xlu1 %v528_v1  ;;  %v164_v4 = vld [vmem:[%s676_s0] sm:$0xff]  ;;  %v169_v5 = vadd.f32 %v163_v3, %v162_v2  ;;  %vm196_vm3 = vcmask 64512   ;;  %s363_s20 = sshll.u32 %s631_s23, 1  ;;  %s367_s29 = sshll.u32 %s566_s13, 1  ;;  %vm261_vm8 = vcmask 1040384  }
  0x2a   : > { %423 = vset.pattern.permute.xlu2 %v527_v0  ;;  %177 = vperm.xlu0 %420, %v164_v4   ;;  %v166_v11 = vshrl.u32 %v165_v9, 7  ;;  %v168_v12 = vand.u32 127, %v165_v9  ;;  %s280_s4 = scalar_lea.hbm %s678_s2, %s367_s29  ;;  %s161_s5 = scalar_lea.vmem [#allocation5], %s363_s20  ;;  %vm266_vm9 = vcmp.lt.s32.totalorder %v165_v9, 256 }
  0x2b   : > { %170 = vadd.xlane.f32.xlu1 %v169_v5  ;;  %s282_s6 = sshll.u32 %s161_s5, 4  ;;  %s284_s7 = sshll.u32 %s280_s4, 4  ;;  %s283_s6 = int_to_ptr.vmem [resolvable:$true] %s282_s6  ;;  %s285_s7 = int_to_ptr.hbm [resolvable:$true] %s284_s7 }
  0x2c   : > { %v173_v13 = vsub.s32 %v168_v12, %v166_v11  ;;  %s270_s13 = scalar_lea.sflag [#allocation4], %s631_s23  ;;  %s473_s8 = sshra.s32 %s285_s7, 4  ;;  %s474_s8 = int_to_ptr.hbm [resolvable:$true] %s473_s8 }
  0x2d   : > { %s475_s14 = scalar_lea.hbm %s474_s8, 2  ;;  %s479_s19 = scalar_lea.hbm %s678_s2, 4 }
  0x2e   : > { %vm174_vm0 = vcmp.eq.s32.totalorder %v173_v13, 4294967295  ;;  %vm182_vm1 = vcmp.eq.s32.totalorder %v173_v13, 0  ;;  %vm189_vm2 = vcmp.eq.s32.totalorder %v173_v13, 1  ;;  %p476_p6 = scmp.ne.s32.totalorder %s474_s8, %s475_s14  ;;  %p480_p0 = scmp.lt.s32.totalorder %s474_s8, %s678_s2 }
  0x2f   : > { %p481_p1 = scmp.lt.s32.totalorder %s479_s19, %s475_s14 }
  0x30   : > { %p477_p9 = pnand %p476_p6, %p595_p11 }
  0x31   : > { %p482_p3 = por %p481_p1, %p480_p0 }
  0x32   : > { %421 = vset.pattern.permute.xlu0 %v529_v6  ;;  %p478_p13 = pneg %p477_p9 }
  0x33   : > { %184 = vperm.xlu0 %421, %v164_v4  }
  0x34   : > { %p483_p4 = pnand %p482_p3, %p478_p13 }
  0x3b   : > { %424 = vset.pattern.permute.xlu0 %v527_v0 }
  0x44   : > { %191 = vperm.xlu1 %422, %v164_v4  }
  0x9c   : > { %v178_v10 = vpop.permute.xlu0 %177 }
  0x9d   : > { %v180_v15 = vsel %vm174_vm0, %v178_v10, 0.0 }
  0x9e   : > { %v171_v7 = vpop.xlane.xlu1 %170 }
  0x9f   : > { %v172_v8 = vmul.f32 0.00390625, %v171_v7 }
  0xa1   : > { %215 = vmatpush.msra.mxu0 %v172_v8 }
  0xa5   : > { %v185_v14 = vpop.permute.xlu0 %184 }
  0xa6   : > { %v187_v16 = vsel %vm182_vm1, %v185_v14, 0.0 }
  0xa7   : > { %v188_v17 = vadd.f32 %v187_v16, %v180_v15 }
  0xb6   : > { %v192_v18 = vpop.permute.xlu1 %191 }
  0xb7   : > { %v194_v19 = vsel %vm189_vm2, %v192_v18, 0.0 }
  0xb8   : > { %v195_v20 = vadd.f32 %v194_v19, %v188_v17 }
  0xba   : > { %364 = vmatmul.msk.f32.vlgmr.msra.gmra.mxu0 %vm196_vm3, %v195_v20 }
 0x137   : > { %v217_v21 = vpop.f32.mrf.mxu0 }
 0x138   : > { %v365_v22 = vmul.f32 -1.442695, %v217_v21 }
 0x13a   : > { %425 = vpow2.f32 %v365_v22 }
 0x140   : > { %v426_v23 = vpop.eup %425 }
 0x141   : > { %v223_v24 = vadd.f32 1.0, %v426_v23 }
 0x143   : > { %427 = vrcp.f32 %v223_v24  ;;  %v235_v28 = vand.u32 2147483648, %v223_v24  ;;  %v233_v30 = vand.u32 2147483647, %v223_v24  ;;  %vm229_vm5 = vweird.f32 %v223_v24 }
 0x145   : > { %v236_v32 = vor.u32 1.1754944e-38, %v235_v28  ;;  %vm234_vm7 = vcmp.eq.f32.partialorder %v233_v30, 8.507059e+37 }
 0x149   : > { %v428_v25 = vpop.eup %427 }
 0x14a   : > { %v225_v26 = vmul.f32 %v428_v25, %v223_v24  ;;  %vm230_vm4 = vweird.f32 %v428_v25 }
 0x14b   : > { %vm231_vm6 = vmor %vm229_vm5, %vm230_vm4 }
 0x14c   : > { %v226_v27 = vsub.f32 1.0, %v225_v26 }
 0x14e   : > { %v227_v29 = vmul.f32 %v428_v25, %v226_v27 }
 0x150   : > { %v228_v31 = vadd.f32 %v428_v25, %v227_v29 }
 0x152   : > { %v232_v33 = vsel %vm231_vm6, %v428_v25, %v228_v31 }
 0x153   : > { %v237_v34 = vsel %vm234_vm7, %v236_v32, %v232_v33 }
 0x154   : > { %241 = vperm.xlu2 %423, %v237_v34  }
 0x1ae   : > { %v242_v35 = vpop.permute.xlu2 %241 }
 0x1af   : > { %v244_v36 = vmul.f32 %v242_v35, %v162_v2  ;;  %v245_v37 = vmul.f32 %v242_v35, %v163_v3 }
 0x1b1   : > { %v246_v38 = vrot.slane %v244_v36, 4  ;;  %v252_v39 = vrot.slane %v245_v37, 4 }
 0x1b3   : > { %v247_v40 = vadd.f32 %v246_v38, %v244_v36  ;;  %v253_v41 = vadd.f32 %v252_v39, %v245_v37 }
 0x1b5   : > { %v248_v42 = vrot.slane %v247_v40, 2  ;;  %v254_v43 = vrot.slane %v253_v41, 2 }
 0x1b7   : > { %v249_v44 = vadd.f32 %v248_v42, %v247_v40  ;;  %v255_v45 = vadd.f32 %v254_v43, %v253_v41 }
 0x1b9   : > { %v250_v46 = vrot.slane %v249_v44, 1  ;;  %v256_v47 = vrot.slane %v255_v45, 1 }
 0x1bb   : > { %v257_v48 = vadd.f32 %v256_v47, %v255_v45  ;;  %v251_v49 = vadd.f32 %v250_v46, %v249_v44 }
 0x1bd   : > { %v260_v50 = vrot.slane %v257_v48, 7 }
 0x1bf   : > { %v262_v51 = vsel %vm261_vm8, %v251_v49, %v260_v50 }
 0x1c0   : > { %268 = vst.msk [vmem:[%s161_s5] sm:$0x3] %vm266_vm9, %v262_v51 }
 0x1c1   : > { %486 = shalt.err (!%p483_p4)
}
 0x1c2   : > { %373 = dma.vmem_to_hbm [thread:$0]  (%p595_p11), %s283_s6, 32, %s285_s7, %s270_s13  }
 0x1c3 PF: > { %s296_s23 = sand.u32 1, %s513_s9   ;;  %p684_p7 = scmp.ge.s32.totalorder %s525_s12, 2 }
 0x1c4   : > { %s297_s26 = scalar_lea.sflag [#allocation4], %s296_s23 }
 0x1c5   : > { %p380_p5 = pnand %p684_p7, %p599_p12 }
 0x1c7   : > { %p381_p8 = pneg %p380_p5 }
 0x1c9   : > { %508 = dma.done.wait (%p381_p8), %s297_s26, 32  }
 0x1ca   : > { %510 = vsyncadd (%p381_p8), %s297_s26, 4294967264  ;;  %p15_p10 = scmp.ge.s32.totalorder %s570_s15, 4   ;;  %s685_s9 = smov %s517_s10 }
 0x1cb   : > { %s686_s10 = smov %s521_s11  ;;  %s687_s11 = smov %s582_s18 }
 0x1cc   : > { %s688_s12 = smov %s570_s15  ;;  %17 = sbr.rel (!%p15_p10) target bundleno = 5 (0x5), region = 73 }
 0x1d1   :  { %303 = vsyncpa [#allocation3], 1 }
 0x1d2   :  { %305 = vsyncpa [#allocation3 + $0x1], 1 }
 0x1d3   :  { %306 = vsyncpa [#allocation4], 1 }
 0x1d4   :  { %308 = vsyncpa [#allocation4 + $0x1], 1 }

</bundles_post_ra>
